<compile_context>
chip_gen: v5e
topology: v5e:2x2
jax: 0.10.0
libtpu: 0.0.40
codegen_flags: <defaults>
</compile_context>

<pallas_src>
import jax
import jax.numpy as jnp
from jax.experimental import pallas as pl
from jax.experimental.pallas import tpu as pltpu


def _torsion_kernel(x_ref, w_ref, b_ref, phi_ref, psi_ref):
    # x_ref:   (TB, 1, TL, F) -- N=0 slice of TB batch rows, TL rows of L
    # w_ref:   (72, F)        -- gamma-folded, transposed projection (phi;psi)
    # b_ref:   (72, 1)        -- beta-folded bias
    # phi/psi: (TB, 36, TL)   -- lane-dense (L on lane axis) outputs
    dn = (((1,), (1,)), ((), ()))
    tb = x_ref.shape[0]
    for i in range(tb):  # static trip count, unrolled at trace time
        x = x_ref[i, 0].astype(jnp.float32)                 # (TL, F)

        # LayerNorm statistics (torch defaults: biased variance, eps = 1e-5).
        mean = jnp.mean(x, axis=-1, keepdims=True)
        centered = x - mean
        var = jnp.mean(centered * centered, axis=-1, keepdims=True)
        x_hat = centered * jax.lax.rsqrt(var + 1e-5)        # (TL, F)

        # Single MXU push: (72, F) contracted with (TL, F) over F -> (72, TL).
        # Result is produced directly in the transposed layout; any x_hat
        # operand relayout happens once (was potentially twice with two 36-row
        # matmuls).
        out = jax.lax.dot_general(w_ref[...], x_hat, dn,
                                  preferred_element_type=jnp.float32)
        out = out + b_ref[...]                              # (72, TL)

        phi_ref[i] = out[:36].astype(phi_ref.dtype)
        psi_ref[i] = out[36:].astype(psi_ref.dtype)


def _pick_tiles(B, L):
    """Choose (batch-fold TB, L-tile TL) block sizes.

    * TL is a multiple of 128 (unmasked lane-dense stores) whenever L allows,
      capped at 2048 so blocks stay tiny relative to VMEM on every generation
      while amortizing per-grid-step overhead.
    * For small L (< 128, lane-masked regime) several batch rows are folded
      per step, but at least two grid steps are kept when B allows so both
      v7x TensorCores get work.
    """
    if L < 128:
        tl = L
        target = max(1, 1024 // max(L, 1))
        tb = 1
        for d in range(1, B + 1):          # largest divisor of B <= target
            if B % d == 0 and d <= target:
                tb = d
        if tb == B and B > 1:
            # keep >= 2 grid steps for megacore sharding
            for d in range(B - 1, 0, -1):
                if B % d == 0:
                    tb = d
                    break
        return tb, tl

    if L % 128 == 0:
        tl = min(L, 2048)
    else:
        tl = min((L // 128) * 128, 2048)   # partial tail tile handled by Pallas
    if B == 1 and tl >= L:
        # single-batch, single-tile grid would leave one v7x core idle
        tl = max(128, pl.cdiv(pl.cdiv(L, 2), 128) * 128)
    return 1, tl


def torsion_network(x, weight, bias, gamma, beta):
    """x: (B, N, L, F) f32; weight: (F, 72); bias: (72,); gamma/beta: (F,).

    Returns (logits_phi, logits_psi), each (B, 36, L) float32, matching
    TorsionNetwork.forward.
    """
    B, _, L, F = x.shape

    # Fold LayerNorm affine into the projection (algebraically exact):
    #   (x_hat * gamma + beta) @ W + b == x_hat @ (diag(gamma) @ W) + (beta @ W + b)
    w_fold = (weight * gamma[:, None]).T                    # (72, F)
    b_fold = (beta @ weight + bias).reshape(72, 1)          # (72, 1)

    tb, tl = _pick_tiles(B, L)
    grid = (B // tb, pl.cdiv(L, tl))

    phi, psi = pl.pallas_call(
        _torsion_kernel,
        out_shape=(
            jax.ShapeDtypeStruct((B, 36, L), jnp.float32),
            jax.ShapeDtypeStruct((B, 36, L), jnp.float32),
        ),
        grid_spec=pltpu.PrefetchScalarGridSpec(
            num_scalar_prefetch=0,
            grid=grid,
            in_specs=[
                # N=0 slice selected here: only that slab is DMA'd from HBM.
                pl.BlockSpec((tb, 1, tl, F), lambda b, l: (b, 0, l, 0)),
                pl.BlockSpec((72, F), lambda b, l: (0, 0)),
                pl.BlockSpec((72, 1), lambda b, l: (0, 0)),
            ],
            out_specs=[
                pl.BlockSpec((tb, 36, tl), lambda b, l: (b, 0, l)),
                pl.BlockSpec((tb, 36, tl), lambda b, l: (b, 0, l)),
            ],
        ),
        compiler_params=pltpu.CompilerParams(
            dimension_semantics=("parallel", "parallel")),
    )(x, w_fold, b_fold)

    return phi, psi


def _reference(x, weight, bias, gamma, beta):
    xs = x[:, 0]
    mean = jnp.mean(xs, axis=-1, keepdims=True)
    var = jnp.mean((xs - mean) ** 2, axis=-1, keepdims=True)
    y = (xs - mean) / jnp.sqrt(var + 1e-5) * gamma + beta
    logits = jnp.einsum("blf,fo->blo", y, weight) + bias
    logits = jnp.transpose(logits, (0, 2, 1))
    return logits[:, :36], logits[:, 36:]


def _check(B, N, L, F, case):
    key = jax.random.fold_in(jax.random.PRNGKey(0), case)
    k_x, k_w, k_b, k_g, k_be = jax.random.split(key, 5)

    x = jax.random.normal(k_x, (B, N, L, F), dtype=jnp.float32)
    # Deterministic synthetic parameters (shapes from nn.LayerNorm / nn.Linear).
    weight = jax.random.normal(k_w, (F, 72), dtype=jnp.float32) * 0.05
    bias = jax.random.normal(k_b, (72,), dtype=jnp.float32) * 0.01
    gamma = 1.0 + 0.1 * jax.random.normal(k_g, (F,), dtype=jnp.float32)
    beta = 0.1 * jax.random.normal(k_be, (F,), dtype=jnp.float32)

    phi, psi = torsion_network(x, weight, bias, gamma, beta)
    jax.block_until_ready((phi, psi))

    ref_phi, ref_psi = _reference(x, weight, bias, gamma, beta)
    assert phi.shape == (B, 36, L) and psi.shape == (B, 36, L)
    assert jnp.allclose(phi, ref_phi, atol=1e-4, rtol=1e-4), \
        float(jnp.max(jnp.abs(phi - ref_phi)))
    assert jnp.allclose(psi, ref_psi, atol=1e-4, rtol=1e-4), \
        float(jnp.max(jnp.abs(psi - ref_psi)))


if __name__ == "__main__":
    # Small shape: torsion head reads only the N=0 feature track.
    _check(B=2, N=3, L=8, F=32, case=0)
    # Lane-dense multi-tile path (B=1 split across two 128-wide L tiles).
    _check(B=1, N=2, L=256, F=32, case=1)
    print("KERNEL_OK")
</pallas_src>

<mosaic_0001>
module attributes {stable_mosaic.version = 11 : i64} {
  func.func @_torsion_kernel(%arg0: i32, %arg1: i32, %arg2: memref<1x1x8x32xf32, #tpu.memory_space<vmem>>, %arg3: memref<72x32xf32, #tpu.memory_space<vmem>>, %arg4: memref<72x1xf32, #tpu.memory_space<vmem>>, %arg5: memref<1x36x8xf32, #tpu.memory_space<vmem>>, %arg6: memref<1x36x8xf32, #tpu.memory_space<vmem>>) attributes {dimension_semantics = [#tpu.dimension_semantics<parallel>, #tpu.dimension_semantics<parallel>], iteration_bounds = array<i64: 2, 1>, scalar_prefetch = 0 : i64, scratch_operands = 0 : i64, tpu.core_type = #tpu.core_type<tc>, window_params = [{transform_indices = @transform_0, window_bounds = array<i64: 1, 1, 8, 32>}, {pipeline_mode = #tpu.pipeline_mode<synchronous>, transform_indices = @transform_1, window_bounds = array<i64: 72, 32>}, {pipeline_mode = #tpu.pipeline_mode<synchronous>, transform_indices = @transform_2, window_bounds = array<i64: 72, 1>}, {transform_indices = @transform_3, window_bounds = array<i64: 1, 36, 8>}, {transform_indices = @transform_4, window_bounds = array<i64: 1, 36, 8>}]} {
    %c0 = arith.constant 0 : index
    %c0_0 = arith.constant 0 : index
    %c0_1 = arith.constant 0 : index
    %c0_2 = arith.constant 0 : index
    %0 = vector.load %arg2[%c0, %c0_0, %c0_1, %c0_2] : memref<1x1x8x32xf32, #tpu.memory_space<vmem>>, vector<1x1x8x32xf32>
    %1 = vector.shape_cast %0 : vector<1x1x8x32xf32> to vector<8x32xf32>
    %cst = arith.constant dense<0.000000e+00> : vector<8xf32>
    %2 = vector.multi_reduction <add>, %1, %cst [1] : vector<8x32xf32> to vector<8xf32>
    %3 = vector.shape_cast %2 : vector<8xf32> to vector<8x1xf32>
    %cst_3 = arith.constant 3.200000e+01 : f32
    %4 = vector.broadcast %cst_3 : f32 to vector<8x1xf32>
    %5 = arith.divf %3, %4 : vector<8x1xf32>
    %6 = vector.broadcast %5 : vector<8x1xf32> to vector<8x32xf32>
    %7 = arith.subf %1, %6 : vector<8x32xf32>
    %8 = arith.mulf %7, %7 : vector<8x32xf32>
    %cst_4 = arith.constant dense<0.000000e+00> : vector<8xf32>
    %9 = vector.multi_reduction <add>, %8, %cst_4 [1] : vector<8x32xf32> to vector<8xf32>
    %10 = vector.shape_cast %9 : vector<8xf32> to vector<8x1xf32>
    %cst_5 = arith.constant 3.200000e+01 : f32
    %11 = vector.broadcast %cst_5 : f32 to vector<8x1xf32>
    %12 = arith.divf %10, %11 : vector<8x1xf32>
    %cst_6 = arith.constant 9.99999974E-6 : f32
    %13 = vector.broadcast %cst_6 : f32 to vector<8x1xf32>
    %14 = arith.addf %12, %13 : vector<8x1xf32>
    %15 = math.rsqrt %14 : vector<8x1xf32>
    %16 = vector.broadcast %15 : vector<8x1xf32> to vector<8x32xf32>
    %17 = arith.mulf %7, %16 : vector<8x32xf32>
    %c0_7 = arith.constant 0 : index
    %c0_8 = arith.constant 0 : index
    %18 = vector.load %arg3[%c0_7, %c0_8] : memref<72x32xf32, #tpu.memory_space<vmem>>, vector<72x32xf32>
    %cst_9 = arith.constant dense<0.000000e+00> : vector<72x8xf32>
    %19 = tpu.matmul %18, %17, %cst_9 {dimension_numbers = #tpu.dot_dimension_numbers<[1], [1], [0], [0], [0, 0, 1, 0], [], []>} : vector<72x32xf32>, vector<8x32xf32>, vector<72x8xf32> -> vector<72x8xf32>
    %c0_10 = arith.constant 0 : index
    %c0_11 = arith.constant 0 : index
    %20 = vector.load %arg4[%c0_10, %c0_11] : memref<72x1xf32, #tpu.memory_space<vmem>>, vector<72x1xf32>
    %21 = vector.broadcast %20 : vector<72x1xf32> to vector<72x8xf32>
    %22 = arith.addf %19, %21 : vector<72x8xf32>
    %23 = vector.extract_strided_slice %22 {offsets = [0, 0], sizes = [36, 8], strides = [1, 1]} : vector<72x8xf32> to vector<36x8xf32>
    %c0_12 = arith.constant 0 : index
    %c0_13 = arith.constant 0 : index
    %c0_14 = arith.constant 0 : index
    %24 = vector.load %arg5[%c0_12, %c0_13, %c0_14] : memref<1x36x8xf32, #tpu.memory_space<vmem>>, vector<1x36x8xf32>
    %25 = vector.shape_cast %24 : vector<1x36x8xf32> to vector<36x8xf32>
    %26 = vector.shape_cast %23 : vector<36x8xf32> to vector<1x36x8xf32>
    tpu.vector_store %arg5[%c0_12, %c0_13, %c0_14], %26 {strides = array<i32>} : memref<1x36x8xf32, #tpu.memory_space<vmem>>, vector<1x36x8xf32>,
    %27 = vector.extract_strided_slice %22 {offsets = [36, 0], sizes = [36, 8], strides = [1, 1]} : vector<72x8xf32> to vector<36x8xf32>
    %c0_15 = arith.constant 0 : index
    %c0_16 = arith.constant 0 : index
    %c0_17 = arith.constant 0 : index
    %28 = vector.load %arg6[%c0_15, %c0_16, %c0_17] : memref<1x36x8xf32, #tpu.memory_space<vmem>>, vector<1x36x8xf32>
    %29 = vector.shape_cast %28 : vector<1x36x8xf32> to vector<36x8xf32>
    %30 = vector.shape_cast %27 : vector<36x8xf32> to vector<1x36x8xf32>
    tpu.vector_store %arg6[%c0_15, %c0_16, %c0_17], %30 {strides = array<i32>} : memref<1x36x8xf32, #tpu.memory_space<vmem>>, vector<1x36x8xf32>,
    return
  }
  func.func @transform_0(%arg0: i32, %arg1: i32) -> (i32, i32, i32, i32) {
    %c0_i32 = arith.constant 0 : i32
    %c0_i32_0 = arith.constant 0 : i32
    %c0_i32_1 = arith.constant 0 : i32
    return %arg0, %c0_i32, %arg1, %c0_i32_0 : i32, i32, i32, i32
  }
  func.func @transform_1(%arg0: i32, %arg1: i32) -> (i32, i32) {
    %c0_i32 = arith.constant 0 : i32
    %c0_i32_0 = arith.constant 0 : i32
    %c0_i32_1 = arith.constant 0 : i32
    return %c0_i32, %c0_i32_0 : i32, i32
  }
  func.func @transform_2(%arg0: i32, %arg1: i32) -> (i32, i32) {
    %c0_i32 = arith.constant 0 : i32
    %c0_i32_0 = arith.constant 0 : i32
    %c0_i32_1 = arith.constant 0 : i32
    return %c0_i32, %c0_i32_0 : i32, i32
  }
  func.func @transform_3(%arg0: i32, %arg1: i32) -> (i32, i32, i32) {
    %c0_i32 = arith.constant 0 : i32
    %c0_i32_0 = arith.constant 0 : i32
    return %arg0, %c0_i32, %arg1 : i32, i32, i32
  }
  func.func @transform_4(%arg0: i32, %arg1: i32) -> (i32, i32, i32) {
    %c0_i32 = arith.constant 0 : i32
    %c0_i32_0 = arith.constant 0 : i32
    return %arg0, %c0_i32, %arg1 : i32, i32, i32
  }
}

</mosaic_0001>

<bundles_post_ra>
// kernel: tpu_custom_call.1
= control target key start
LH: loop header
LB: loop body
LE: loop exit
PB: predicated region body
PF: predicated region fallthrough
CT: control target
= control target key end

     0   :  { %s670_s15 = smov 0   ;;  %s672_s16 = smov 0   ;;  %s794_s0 = inlined_call_operand.vmem [shape: f32[2,3,8,32], index: 0, kind: input, shape index: {}]   ;;  %s795_s1 = inlined_call_operand.vmem [shape: f32[72,32], index: 1, kind: input, shape index: {}]   ;;  %s796_s2 = inlined_call_operand.vmem [shape: f32[72,1], index: 2, kind: input, shape index: {}]   ;;  %s797_s3 = inlined_call_operand.vmem [shape: f32[2,36,8], index: 3, kind: output, shape index: {0}]   ;;  %s798_s4 = inlined_call_operand.vmem [shape: f32[2,36,8], index: 4, kind: output, shape index: {1}]  }
   0x1   :  { %s674_s17 = smov 0  }
   0x2 LB: > { %s27_s18 = sadd.s32 1, %s637_s16  ;;  %p565_p0 = scmp.ge.s32.totalorder %s641_s17, 1  ;;  %s641_s17 = sphi %s674_s17, %s15_s17   ;;  %s637_s16 = sphi %s672_s16, %s800_s16   ;;  %s633_s15 = sphi %s670_s15, %s799_s15  }
   0x3   : > { %p29_p1 = scmp.ge.s32.totalorder %s27_s18, 2  ;;  %p186_p2 = scmp.lt.s32.totalorder %s641_s17, 3 }
   0x5   : > { %s802_s18 = smov (%p29_p1, %s27_s18), 0  ;;  %p187_p3 = pnand %p565_p0, %p186_p2 }
   0x6   : > { %p226_p4 = scmp.lt.s32.totalorder (!%p187_p3), %s633_s15, 1 }
   0x7   : > { %190 = sbr.rel (%p187_p3) target bundleno = 436 (0x1b4), region = 32 }
   0xc   : > { %s804_s15 = smov (!%p226_p4, %s633_s15), 1  ;;  %vm251_vm0 = vcmask 261120   ;;  %v643_v2 = vmov 32.0   ;;  %v644_v14 = vmov 0   ;;  %v290_v15 = vld [vmem:[%s796_s2] sm:$0xff]  ;;  %v291_v16 = vld [vmem:[%s796_s2 + $0x8] sm:$0xff] }
   0xd   : > { %s584_s19 = smul.u32 24, %s804_s15  ;;  %615 = vrcp.f32 %v643_v2  ;;  %612 = vset.pattern.permute.xlu1 %v644_v14  ;;  %613 = vset.pattern.permute.xlu2 %v644_v14  ;;  %v295_v17 = vld [vmem:[%s796_s2 + $0x28] sm:$0xff]  ;;  %v292_v21 = vld [vmem:[%s796_s2 + $0x10] sm:$0xff]  ;;  %v297_v22 = vld [vmem:[%s796_s2 + $0x38] sm:$0xff]  ;;  %vm418_vm5 = vcmask 64512   ;;  %vm423_vm6 = vcmask 60416  }
   0xe   : > { %301 = vperm.xlu1 %612, %v290_v15   ;;  %614 = vset.pattern.permute.xlu0 %v644_v14  ;;  %v293_v25 = vld [vmem:[%s796_s2 + $0x18] sm:$0xff]  ;;  %v294_v27 = vld [vmem:[%s796_s2 + $0x20] sm:$0xff]  ;;  %v296_v30 = vld [vmem:[%s796_s2 + $0x30] sm:$0xff]  ;;  %s585_s11 = smul.u32 40, %s804_s15  ;;  %vm425_vm7 = vcmask 64516  }
   0xf   : > { %s233_s22 = scalar_lea.vmem %s794_s0, %s584_s19  ;;  %311 = vperm.xlu2 %613, %v292_v21   ;;  %v281_v34 = vld [vmem:[%s795_s1] sm:$0xff]  ;;  %v283_v35 = vld [vmem:[%s795_s1 + $0x10] sm:$0xff]  ;;  %v286_v36 = vld [vmem:[%s795_s1 + $0x28] sm:$0xff] }
  0x10   : > { %v250_v0 = vld [vmem:[%s233_s22] sm:$0xff]  ;;  %v287_v37 = vld [vmem:[%s795_s1 + $0x30] sm:$0xff]  ;;  %v282_v39 = vld [vmem:[%s795_s1 + $0x8] sm:$0xff]  ;;  %s767_s14 = scalar_lea.vmem %s797_s3, %s585_s11  ;;  %s249_s20 = scalar_lea.vmem %s798_s4, %s585_s11 }
  0x11   : > { %v252_v1 = vsel %vm251_vm0, %v250_v0, 0.0  ;;  %v298_v38 = vld [vmem:[%s796_s2 + $0x40] sm:$0xff]  ;;  %v284_v40 = vld [vmem:[%s795_s1 + $0x18] sm:$0xff] }
  0x12   : > { %253 = vadd.xlane.f32.xlu0 %v252_v1  ;;  %v288_v41 = vld [vmem:[%s795_s1 + $0x38] sm:$0xff]  ;;  %v285_v42 = vld [vmem:[%s795_s1 + $0x20] sm:$0xff] }
  0x13   : > { %v616_v3 = vpop.eup %615  ;;  %v289_v43 = vld [vmem:[%s795_s1 + $0x40] sm:$0xff] }
  0x14   : > { %v256_v4 = vmul.f32 32.0, %v616_v3  ;;  %vm260_vm1 = vweird.f32 %v616_v3 }
  0x16   : > { %v257_v5 = vsub.f32 1.0, %v256_v4  ;;  %306 = vperm.xlu1 %612, %v291_v16  }
  0x17   : > { %316 = vperm.xlu2 %613, %v293_v25  }
  0x18   : > { %v258_v6 = vmul.f32 %v616_v3, %v257_v5 }
  0x1a   : > { %v259_v7 = vadd.f32 %v616_v3, %v258_v6 }
  0x1c   : > { %v261_v8 = vsel %vm260_vm1, %v616_v3, %v259_v7 }
  0x1e   : > { %326 = vperm.xlu1 %612, %v295_v17  }
  0x1f   : > { %331 = vperm.xlu2 %613, %v296_v30  }
  0x26   : > { %336 = vperm.xlu1 %612, %v297_v22  }
  0x27   : > { %341 = vperm.xlu2 %613, %v298_v38  }
  0x69   : > { %v312_v45 = vpop.permute.xlu2 %311 }
  0x71   : > { %v317_v47 = vpop.permute.xlu2 %316 }
  0x79   : > { %v332_v53 = vpop.permute.xlu2 %331 }
  0x80   : > { %v302_v44 = vpop.permute.xlu1 %301 }
  0x81   : > { %v342_v4 = vpop.permute.xlu2 %341 }
  0x85   : > { %v254_v9 = vpop.xlane.xlu0 %253 }
  0x86   : > { %v262_v10 = vmul.f32 %v261_v8, %v254_v9 }
  0x88   : > { %v263_v11 = vsub.f32 %v250_v0, %v262_v10  ;;  %v307_v46 = vpop.permute.xlu1 %306 }
  0x8a   : > { %v264_v12 = vmul.f32 %v263_v11, %v263_v11 }
  0x8c   : > { %v265_v13 = vsel %vm251_vm0, %v264_v12, 0.0 }
  0x8d   : > { %266 = vadd.xlane.f32.xlu0 %v265_v13 }
  0x90   : > { %v327_v52 = vpop.permute.xlu1 %326 }
  0x98   : > { %v337_v63 = vpop.permute.xlu1 %336 }
  0xa1   : > { %321 = vperm.xlu0 %614, %v294_v27  }
 0x100   : > { %v267_v18 = vpop.xlane.xlu0 %266 }
 0x101   : > { %v268_v19 = vmul.f32 %v267_v18, %v261_v8 }
 0x103   : > { %v269_v20 = vadd.f32 1e-05, %v268_v19 }
 0x105   : > { %617 = vrsqrt.f32 %v269_v20  ;;  %vm276_vm3 = vweird.f32 %v269_v20 }
 0x10b   : > { %v618_v23 = vpop.eup %617 }
 0x10c   : > { %v271_v24 = vmul.f32 %v618_v23, %v269_v20  ;;  %vm277_vm2 = vweird.f32 %v618_v23 }
 0x10d   : > { %vm278_vm4 = vmor %vm276_vm3, %vm277_vm2 }
 0x10e   : > { %v272_v26 = vmul.f32 %v618_v23, %v271_v24 }
 0x110   : > { %v273_v28 = vmul.f32 0.5, %v272_v26 }
 0x112   : > { %v274_v29 = vsub.f32 1.5, %v273_v28 }
 0x113   : > { %v322_v62 = vpop.permute.xlu0 %321 }
 0x114   : > { %v275_v31 = vmul.f32 %v618_v23, %v274_v29 }
 0x116   : > { %v279_v32 = vsel %vm278_vm4, %v618_v23, %v275_v31 }
 0x117   : > { %v280_v33 = vmul.f32 %v279_v32, %v263_v11 }
 0x119   : > { %569 = vmatpush.xpose.msk.msra.mxu0 %vm251_vm0, %v280_v33  ;;  %581 = vmatpush.xpose.msk.msra.mxu1 %vm251_vm0, %v280_v33 }
 0x11a   : > { %582 = vmatpush.xpose.msk.msra.mxu2 %vm251_vm0, %v280_v33  ;;  %583 = vmatpush.xpose.msk.msra.mxu3 %vm251_vm0, %v280_v33 }
 0x11c   : > { %570 = vmatmul.msk.f32.vlgmr.msra.gmra.mxu0 %vm251_vm0, %v281_v34  ;;  %572 = vmatmul.msk.f32.vlgmr.msra.gmra.mxu1 %vm251_vm0, %v283_v35 }
 0x11d   : > { %575 = vmatmul.msk.f32.vlgmr.msra.gmra.mxu2 %vm251_vm0, %v286_v36  ;;  %576 = vmatmul.msk.f32.vlgmr.msra.gmra.mxu3 %vm251_vm0, %v287_v37 }
 0x124   : > { %571 = vmatmul.msk.f32.gmra.mxu0 %vm251_vm0, %v282_v39  ;;  %573 = vmatmul.msk.f32.gmra.mxu1 %vm251_vm0, %v284_v40 }
 0x125   : > { %577 = vmatmul.msk.f32.gmra.mxu3 %vm251_vm0, %v288_v41 }
 0x12c   : > { %574 = vmatmul.msk.f32.gmra.mxu1 %vm251_vm0, %v285_v42 }
 0x12d   : > { %578 = vmatmul.msk.f32.gmra.mxu3 %vm251_vm0, %v289_v43 }
 0x199   : > { %v391_v48 = vpop.f32.mrf.mxu0  ;;  %v397_v49 = vpop.f32.mrf.mxu1 }
 0x19a   : > { %v392_v50 = vadd.f32 %v391_v48, %v302_v44  ;;  %v398_v51 = vadd.f32 %v397_v49, %v312_v45 }
 0x19c   : > { %419 = vst.msk [vmem:[%s767_s14] sm:$0xff] %vm418_vm5, %v392_v50 }
 0x19d   : > { %421 = vst.msk [vmem:[%s767_s14 + $0x10] sm:$0xff] %vm418_vm5, %v398_v51 }
 0x1a0   : > { %v406_v54 = vpop.f32.mrf.mxu2  ;;  %v409_v55 = vpop.f32.mrf.mxu3 }
 0x1a1   : > { %v407_v56 = vadd.f32 %v406_v54, %v327_v52  ;;  %v410_v57 = vadd.f32 %v409_v55, %v332_v53  ;;  %v394_v58 = vpop.f32.mrf.mxu0  ;;  %v400_v59 = vpop.f32.mrf.mxu1 }
 0x1a2   : > { %v395_v60 = vadd.f32 %v394_v58, %v307_v46  ;;  %v401_v61 = vadd.f32 %v400_v59, %v317_v47 }
 0x1a3   : > { %427 = vst.msk [vmem:[%s249_s20 + $0x4] sm:$0xff] %vm418_vm5, %v407_v56 }
 0x1a4   : > { %428 = vst.msk [vmem:[%s249_s20 + $0xc] sm:$0xff] %vm418_vm5, %v410_v57 }
 0x1a5   : > { %420 = vst.msk [vmem:[%s767_s14 + $0x8] sm:$0xff] %vm418_vm5, %v395_v60 }
 0x1a6   : > { %422 = vst.msk [vmem:[%s767_s14 + $0x18] sm:$0xff] %vm418_vm5, %v401_v61 }
 0x1a8   : > { %v412_v0 = vpop.f32.mrf.mxu3 }
 0x1a9   : > { %v413_v1 = vadd.f32 %v412_v0, %v337_v63  ;;  %v403_v2 = vpop.f32.mrf.mxu1 }
 0x1aa   : > { %v404_v3 = vadd.f32 %v403_v2, %v322_v62 }
 0x1ab   : > { %429 = vst.msk [vmem:[%s249_s20 + $0x14] sm:$0xff] %vm418_vm5, %v413_v1 }
 0x1ac   : > { %424 = vst.msk [vmem:[%s767_s14 + $0x20] sm:$0xf] %vm423_vm6, %v404_v3 }
 0x1ad   : > { %426 = vst.msk [vmem:[%s249_s20 - $0x4] sm:$0xf0] %vm425_vm7, %v404_v3 }
 0x1b0   : > { %v415_v5 = vpop.f32.mrf.mxu3 }
 0x1b1   : > { %v416_v6 = vadd.f32 %v415_v5, %v342_v4 }
 0x1b3   : > { %430 = vst.msk [vmem:[%s249_s20 + $0x1c] sm:$0xff] %vm418_vm5, %v416_v6 }
 0x1b4 PF: > { %s15_s17 = sadd.s32 1, %s641_s17   ;;  %s799_s15 = smov %s637_s16 }
 0x1b5   : > { %p12_p5 = scmp.ge.s32.totalorder %s15_s17, 4   ;;  %s800_s16 = smov %s802_s18 }
 0x1b7   :  { %14 = sbr.rel (!%p12_p5) target bundleno = 2 (0x2), region = 74 }

</bundles_post_ra>
